<compile_context>
chip_gen: v7x
topology: tpu7x:2x2x1
jax: 0.10.0
libtpu: 0.0.40
codegen_flags: <defaults>
</compile_context>

<pallas_src>
import functools

import jax
import jax.numpy as jnp
from jax.experimental import pallas as pl
from jax.experimental.pallas import tpu as pltpu


def _round_up(v: int, m: int) -> int:
    return ((v + m - 1) // m) * m


def _dense_kernel(x_ref, w_ref, b_ref, o_ref, acc_ref, *, apply_relu: bool):
    """One (tm, tn) output tile, accumulated over the K grid axis."""
    k = pl.program_id(2)

    @pl.when(k == 0)
    def _():
        acc_ref[...] = jnp.zeros_like(acc_ref)

    # MXU matmul, f32 accumulation.
    acc_ref[...] += jnp.dot(x_ref[...], w_ref[...], preferred_element_type=jnp.float32)

    # Epilogue exactly once: bias + optional ReLU + cast + store.
    @pl.when(k == pl.num_programs(2) - 1)
    def _():
        out = acc_ref[...] + b_ref[...]          # b_ref is (1, tn) -> broadcast over rows (f32 VPU)
        if apply_relu:
            out = jnp.maximum(out, 0.0)
        o_ref[...] = out.astype(o_ref.dtype)


def _pick_tiles(m: int, k: int, n: int):
    """MXU/vreg-aligned tiles, shrunk for small problems (no giant padding at toy shapes)."""
    tm = min(256, _round_up(m, 8))      # sublane axis: multiple of 8
    tk = min(512, _round_up(k, 128))    # lane axis of x / sublane axis of W
    tn = min(256, _round_up(n, 128))    # lane axis of W / output: multiple of 128 (unmasked vst)
    return tm, tn, tk


def dense_forward(x, weight_t, bias=None, nonlinearity=None, *, compute_dtype=jnp.bfloat16):
    """Pallas equivalent of Dense.forward (eval mode).

    x        : [batch, in_features]
    weight_t : [in_features, out_features]  (transposed nn.Linear weight)
    bias     : [out_features] or None
    nonlinearity : None or "ReLU"
    """
    if nonlinearity not in (None, "ReLU"):
        raise NotImplementedError(f"nonlinearity={nonlinearity!r} not supported")

    m, k_dim = x.shape
    k_dim_w, n = weight_t.shape
    assert k_dim == k_dim_w, (x.shape, weight_t.shape)
    out_dtype = x.dtype

    if bias is None:
        bias = jnp.zeros((n,), jnp.float32)

    tm, tn, tk = _pick_tiles(m, k_dim, n)
    m_pad, k_pad, n_pad = _round_up(m, tm), _round_up(k_dim, tk), _round_up(n, tn)

    # Cast operands for the MXU; keep bias / accumulator / epilogue in f32.
    x_c = x.astype(compute_dtype)
    w_c = weight_t.astype(compute_dtype)
    b_c = bias.astype(jnp.float32).reshape(1, n)

    # Zero-pad to tile multiples (zeros contribute nothing to the K reduction; padded
    # rows/cols are sliced away below).
    if (m_pad, k_pad) != (m, k_dim):
        x_c = jnp.pad(x_c, ((0, m_pad - m), (0, k_pad - k_dim)))
    if (k_pad, n_pad) != (k_dim, n):
        w_c = jnp.pad(w_c, ((0, k_pad - k_dim), (0, n_pad - n)))
    if n_pad != n:
        b_c = jnp.pad(b_c, ((0, 0), (0, n_pad - n)))

    grid = (m_pad // tm, n_pad // tn, k_pad // tk)
    kernel = functools.partial(_dense_kernel, apply_relu=(nonlinearity == "ReLU"))

    in_bytes = jnp.dtype(compute_dtype).itemsize
    out_bytes = jnp.dtype(out_dtype).itemsize
    # Double-buffered x/W/out tiles + f32 acc scratch + bias tile, with 2x headroom,
    # capped at ~48 MiB so the same tiling is safe on v7x's 64 MiB VMEM.
    vmem_need = (2 * (tm * tk + tk * tn) * in_bytes
                 + 2 * tm * tn * out_bytes
                 + tm * tn * 4
                 + 2 * tn * 4)
    vmem_limit = min(max(32 * 1024 * 1024, 2 * vmem_need), 48 * 1024 * 1024)

    cost = pl.CostEstimate(
        flops=2 * m * n * k_dim,
        transcendentals=0,
        bytes_accessed=m * k_dim * in_bytes + k_dim * n * in_bytes + n * 4 + m * n * out_bytes,
    )

    out_padded = pl.pallas_call(
        kernel,
        out_shape=jax.ShapeDtypeStruct((m_pad, n_pad), out_dtype),
        grid_spec=pltpu.PrefetchScalarGridSpec(
            num_scalar_prefetch=0,
            grid=grid,
            in_specs=[
                pl.BlockSpec((tm, tk), lambda i, j, k: (i, k)),   # x tile
                pl.BlockSpec((tk, tn), lambda i, j, k: (k, j)),   # W tile
                pl.BlockSpec((1, tn), lambda i, j, k: (0, j)),    # bias slice (only j-th tile)
            ],
            out_specs=pl.BlockSpec((tm, tn), lambda i, j, k: (i, j)),
            scratch_shapes=[pltpu.VMEM((tm, tn), jnp.float32)],   # resident f32 accumulator
        ),
        compiler_params=pltpu.CompilerParams(
            dimension_semantics=("parallel", "parallel", "arbitrary"),
            vmem_limit_bytes=int(vmem_limit),
        ),
        cost_estimate=cost,
    )(x_c, w_c, b_c)

    if (m_pad, n_pad) != (m, n):
        out_padded = out_padded[:m, :n]
    return out_padded


def init_dense_params(key, in_features, out_features):
    """Deterministic parameter init matching Dense.reset_parameters.

    nn.init.xavier_normal_ on a weight of shape [out, in]:
        std = sqrt(2 / (fan_in + fan_out)) = sqrt(2 / (in + out))
    Bias keeps nn.Linear's default init: U(-1/sqrt(in), 1/sqrt(in)).
    """
    kw, kb = jax.random.split(key)
    std = (2.0 / (in_features + out_features)) ** 0.5
    w = jax.random.normal(kw, (out_features, in_features), jnp.float32) * std
    bound = 1.0 / (in_features ** 0.5)
    b = jax.random.uniform(kb, (out_features,), jnp.float32, -bound, bound)
    return w, b


if __name__ == "__main__":
    batch, in_features, out_features = 8, 32, 64

    key = jax.random.PRNGKey(0)
    kx, kp = jax.random.split(key)

    x = jax.random.normal(kx, (batch, in_features), jnp.float32)
    w, b = init_dense_params(kp, in_features, out_features)   # w: [out, in] like PyTorch
    w_t = w.T                                                  # kernel layout: [in, out]

    # Dense(in_features, out_features, dropout=0.1, nonlinearity="ReLU"), eval mode.
    out = dense_forward(x, w_t, b, nonlinearity="ReLU")
    out = jax.block_until_ready(out)

    # Reference in plain JAX (eval-mode dropout = identity). Kernel uses bf16 operands with
    # f32 accumulation, so compare with a tolerance appropriate for bf16 inputs.
    ref = jnp.maximum(x @ w_t + b, 0.0)
    assert out.shape == (batch, out_features)
    assert out.dtype == x.dtype
    assert jnp.allclose(out, ref, atol=2e-2, rtol=2e-2), float(jnp.max(jnp.abs(out - ref)))

    print("KERNEL_OK")
</pallas_src>

<mosaic_0001>
module attributes {stable_mosaic.version = 11 : i64} {
  func.func @_dense_kernel(%arg0: i32, %arg1: i32, %arg2: i32, %arg3: memref<8x128xbf16, #tpu.memory_space<vmem>>, %arg4: memref<128x128xbf16, #tpu.memory_space<vmem>>, %arg5: memref<1x128xf32, #tpu.memory_space<vmem>>, %arg6: memref<8x128xf32, #tpu.memory_space<vmem>>, %arg7: memref<8x128xf32, #tpu.memory_space<vmem>>) attributes {dimension_semantics = [#tpu.dimension_semantics<parallel>, #tpu.dimension_semantics<parallel>, #tpu.dimension_semantics<arbitrary>], iteration_bounds = array<i64: 1, 1, 1>, scalar_prefetch = 0 : i64, scratch_operands = 1 : i64, tpu.core_type = #tpu.core_type<tc>, window_params = [{transform_indices = @transform_0, window_bounds = array<i64: 8, 128>}, {transform_indices = @transform_1, window_bounds = array<i64: 128, 128>}, {transform_indices = @transform_2, window_bounds = array<i64: 1, 128>}, {transform_indices = @transform_3, window_bounds = array<i64: 8, 128>}]} {
    %c0_i32 = arith.constant 0 : i32
    %0 = arith.cmpi eq, %arg2, %c0_i32 : i32
    %1 = arith.extui %0 : i1 to i32
    %c0_i32_0 = arith.constant 0 : i32
    %2 = arith.cmpi ne, %1, %c0_i32_0 : i32
    scf.if %2 {
      %cst_10 = arith.constant 0.000000e+00 : f32
      %12 = vector.broadcast %cst_10 : f32 to vector<8x128xf32>
      %c0_11 = arith.constant 0 : index
      %c0_12 = arith.constant 0 : index
      %13 = vector.load %arg7[%c0_11, %c0_12] : memref<8x128xf32, #tpu.memory_space<vmem>>, vector<8x128xf32>
      tpu.vector_store %arg7[%c0_11, %c0_12], %12 {strides = array<i32>} : memref<8x128xf32, #tpu.memory_space<vmem>>, vector<8x128xf32>,
    } else {
    }
    %c0 = arith.constant 0 : index
    %c0_1 = arith.constant 0 : index
    %3 = vector.load %arg7[%c0, %c0_1] : memref<8x128xf32, #tpu.memory_space<vmem>>, vector<8x128xf32>
    %c0_2 = arith.constant 0 : index
    %c0_3 = arith.constant 0 : index
    %4 = vector.load %arg3[%c0_2, %c0_3] : memref<8x128xbf16, #tpu.memory_space<vmem>>, vector<8x128xbf16>
    %c0_4 = arith.constant 0 : index
    %c0_5 = arith.constant 0 : index
    %5 = vector.load %arg4[%c0_4, %c0_5] : memref<128x128xbf16, #tpu.memory_space<vmem>>, vector<128x128xbf16>
    %cst = arith.constant dense<0.000000e+00> : vector<8x128xf32>
    %6 = tpu.matmul %4, %5, %cst {dimension_numbers = #tpu.dot_dimension_numbers<[1], [0], [0], [1], [0, 0, 1, 1], [], []>} : vector<8x128xbf16>, vector<128x128xbf16>, vector<8x128xf32> -> vector<8x128xf32>
    %7 = arith.addf %3, %6 : vector<8x128xf32>
    %c0_6 = arith.constant 0 : index
    %c0_7 = arith.constant 0 : index
    %8 = vector.load %arg7[%c0_6, %c0_7] : memref<8x128xf32, #tpu.memory_space<vmem>>, vector<8x128xf32>
    tpu.vector_store %arg7[%c0_6, %c0_7], %7 {strides = array<i32>} : memref<8x128xf32, #tpu.memory_space<vmem>>, vector<8x128xf32>,
    %c0_i32_8 = arith.constant 0 : i32
    %9 = arith.cmpi eq, %arg2, %c0_i32_8 : i32
    %10 = arith.extui %9 : i1 to i32
    %c0_i32_9 = arith.constant 0 : i32
    %11 = arith.cmpi ne, %10, %c0_i32_9 : i32
    scf.if %11 {
      %c0_10 = arith.constant 0 : index
      %c0_11 = arith.constant 0 : index
      %12 = vector.load %arg7[%c0_10, %c0_11] : memref<8x128xf32, #tpu.memory_space<vmem>>, vector<8x128xf32>
      %c0_12 = arith.constant 0 : index
      %c0_13 = arith.constant 0 : index
      %13 = vector.load %arg5[%c0_12, %c0_13] : memref<1x128xf32, #tpu.memory_space<vmem>>, vector<1x128xf32>
      %14 = vector.broadcast %13 : vector<1x128xf32> to vector<8x128xf32>
      %15 = arith.addf %12, %14 : vector<8x128xf32>
      %cst_14 = arith.constant 0.000000e+00 : f32
      %16 = vector.broadcast %cst_14 : f32 to vector<8x128xf32>
      %17 = arith.maximumf %15, %16 : vector<8x128xf32>
      %c0_15 = arith.constant 0 : index
      %c0_16 = arith.constant 0 : index
      %18 = vector.load %arg6[%c0_15, %c0_16] : memref<8x128xf32, #tpu.memory_space<vmem>>, vector<8x128xf32>
      tpu.vector_store %arg6[%c0_15, %c0_16], %17 {strides = array<i32>} : memref<8x128xf32, #tpu.memory_space<vmem>>, vector<8x128xf32>,
    } else {
    }
    return
  }
  func.func @transform_0(%arg0: i32, %arg1: i32, %arg2: i32) -> (i32, i32) {
    %c0_i32 = arith.constant 0 : i32
    return %arg0, %arg2 : i32, i32
  }
  func.func @transform_1(%arg0: i32, %arg1: i32, %arg2: i32) -> (i32, i32) {
    %c0_i32 = arith.constant 0 : i32
    return %arg2, %arg1 : i32, i32
  }
  func.func @transform_2(%arg0: i32, %arg1: i32, %arg2: i32) -> (i32, i32) {
    %c0_i32 = arith.constant 0 : i32
    %c0_i32_0 = arith.constant 0 : i32
    return %c0_i32, %arg1 : i32, i32
  }
  func.func @transform_3(%arg0: i32, %arg1: i32, %arg2: i32) -> (i32, i32) {
    %c0_i32 = arith.constant 0 : i32
    return %arg0, %arg1 : i32, i32
  }
}

</mosaic_0001>

<bundles_post_ra>
// kernel: tpu_custom_call.1
= control target key start
LH: loop header
LB: loop body
LE: loop exit
PB: predicated region body
PF: predicated region fallthrough
CT: control target
= control target key end

     0   :  { %8 = vsyncpa [#allocation4], 0  ;;  %s383_s0 = inlined_call_operand.hbm [shape: bf16[8,128], index: 0, kind: input, shape index: {}]   ;;  %s384_s1 = inlined_call_operand.hbm [shape: bf16[128,128], index: 1, kind: input, shape index: {}]   ;;  %s385_s2 = inlined_call_operand.vmem [shape: f32[1,128], index: 2, kind: input, shape index: {}]   ;;  %s386_s3 = inlined_call_operand.hbm [shape: f32[8,128], index: 3, kind: output, shape index: {}]  }
   0x1   :  { %9 = vsyncpa [#allocation7], 0 }
   0x2   :  { %10 = vsyncpa [#allocation5], 0  ;;  %s310_s12 = smov [#allocation3]   ;;  %s311_s14 = smov [#allocation6]  }
   0x3   :  { %s17_s13 = sshll.u32 %s310_s12, 4  ;;  %s26_s15 = sshll.u32 %s311_s14, 4  ;;  %s18_s13 = int_to_ptr.vmem [resolvable:$true] %s17_s13  ;;  %s337_s15 = int_to_ptr.vmem [resolvable:$true] %s26_s15 }
   0x4   :  { %s238_s18 = scalar_lea.hbm %s383_s0, 64 }
   0x5   :  { %p239_p0 = scmp.ne.s32.totalorder %s383_s0, %s238_s18  ;;  %p242_p1 = scmp.lt.u32.totalorder %s238_s18, %s383_s0 }
   0x7   :  { %p244_p2 = pnand %p242_p1, %p239_p0 }
   0x9   :  { %247 = shalt.err (!%p244_p2)
}
   0xa   :  { %s248_s23 = scalar_lea.vmem %s18_s13, 64  ;;  %p253_p4 = scmp.lt.s32.totalorder %s18_s13, %s18_s13 }
   0xb   :  { %p249_p3 = scmp.ne.s32.totalorder %s18_s13, %s248_s23  ;;  %p254_p5 = scmp.lt.s32.totalorder %s248_s23, %s248_s23 }
   0xd   :  { %p255_p6 = por %p254_p5, %p253_p4 }
   0xf   :  { %p256_p7 = pnand %p255_p6, %p249_p3 }
  0x11   :  { %259 = shalt.err (!%p256_p7)
}
  0x12   :  { %20 = dma.hbm_to_vmem [thread:$0]  %s383_s0, 64, %s18_s13, [#allocation4]  }
  0x13   :  { %s260_s28 = scalar_lea.hbm %s384_s1, 1024 }
  0x14   :  { %p261_p8 = scmp.ne.s32.totalorder %s384_s1, %s260_s28  ;;  %p264_p9 = scmp.lt.u32.totalorder %s260_s28, %s384_s1 }
  0x16   :  { %p266_p10 = pnand %p264_p9, %p261_p8 }
  0x18   :  { %269 = shalt.err (!%p266_p10)
}
  0x19   :  { %s270_s6 = scalar_lea.vmem %s337_s15, 1024  ;;  %p275_p12 = scmp.lt.s32.totalorder %s337_s15, %s337_s15 }
  0x1a   :  { %p271_p11 = scmp.ne.s32.totalorder %s337_s15, %s270_s6  ;;  %p276_p13 = scmp.lt.s32.totalorder %s270_s6, %s270_s6 }
  0x1c   :  { %p277_p0 = por %p276_p13, %p275_p12 }
  0x1e   :  { %p278_p1 = pnand %p277_p0, %p271_p11 }
  0x20   :  { %281 = shalt.err (!%p278_p1)
}
  0x21   :  { %s312_s0 = smov 64   ;;  %s313_s7 = smov 4  }
  0x22   :  { %32 = dma.hbm_to_vmem [thread:$0]  %s384_s1, 1024, %s337_s15, [#allocation7], %s312_s0, %s312_s0, %s313_s7  }
  0x23   :  { %304 = dma.done.wait [#allocation4], 64  }
  0x24   :  { %305 = vsyncadd [#allocation4], 4294967232 }
  0x25   :  { %306 = dma.done.wait [#allocation7], 1024  }
  0x26   :  { %307 = vsyncadd [#allocation7], 4294966272  ;;  %v314_v0 = vmov 0.0   ;;  %vm315_vm0 = vmmov 0   ;;  %v230_v1 = vld [vmem:[#allocation6] sm:$0xff]   ;;  %v231_v2 = vld [vmem:[#allocation6 + $0x8] sm:$0xff]  }
  0x27   :  { %203 = vmatprep.subr.bf16.mxu0 %v314_v0  ;;  %219 = vmatprep.mubr.msk.bf16.mxu0 %vm315_vm0, %v314_v0  ;;  %v232_v3 = vld [vmem:[#allocation6 + $0x10] sm:$0xff]   ;;  %v233_v4 = vld [vmem:[#allocation6 + $0x18] sm:$0xff]   ;;  %v234_v5 = vld [vmem:[#allocation6 + $0x20] sm:$0xff]   ;;  %s316_s11 = smov [#allocation8]  }
  0x28   :  { %204 = vmatpush3.bf16.msra.mxu0 %v230_v1  ;;  %v235_v6 = vld [vmem:[#allocation6 + $0x28] sm:$0xff]   ;;  %v236_v7 = vld [vmem:[#allocation6 + $0x30] sm:$0xff]   ;;  %v237_v8 = vld [vmem:[#allocation6 + $0x38] sm:$0xff]   ;;  %s175_s12 = sshll.u32 %s316_s11, 4  ;;  %s176_s12 = int_to_ptr.vmem [resolvable:$true] %s175_s12 }
  0x29   :  { %205 = vmatprep.subr.bf16.mxu0 %v314_v0  ;;  %v48_v9 = vld [vmem:[#allocation3] sm:$0xf]  ;;  %s282_s13 = scalar_lea.vmem %s176_s12, 128  ;;  %p287_p3 = scmp.lt.s32.totalorder %s176_s12, %s176_s12 }
  0x2a   :  { %v193_v10 = vld [vmem:[%s385_s2] ss:$0 sm:$0xff]  ;;  %p283_p2 = scmp.ne.s32.totalorder %s176_s12, %s282_s13  ;;  %p288_p4 = scmp.lt.s32.totalorder %s282_s13, %s282_s13 }
  0x2c   :  { %206 = vmatpush3.bf16.msra.mxu0 %v231_v2  ;;  %p289_p5 = por %p288_p4, %p287_p3 }
  0x2d   :  { %207 = vmatprep.subr.bf16.mxu0 %v314_v0 }
  0x2e   :  { %p290_p6 = pnand %p289_p5, %p283_p2 }
  0x30   :  { %208 = vmatpush3.bf16.msra.mxu0 %v232_v3 }
  0x31   :  { %209 = vmatprep.subr.bf16.mxu0 %v314_v0 }
  0x34   :  { %210 = vmatpush3.bf16.msra.mxu0 %v233_v4 }
  0x35   :  { %211 = vmatprep.subr.bf16.mxu0 %v314_v0 }
  0x38   :  { %212 = vmatpush3.bf16.msra.mxu0 %v234_v5 }
  0x39   :  { %213 = vmatprep.subr.bf16.mxu0 %v314_v0 }
  0x3c   :  { %214 = vmatpush3.bf16.msra.mxu0 %v235_v6 }
  0x3d   :  { %215 = vmatprep.subr.bf16.mxu0 %v314_v0 }
  0x40   :  { %216 = vmatpush3.bf16.msra.mxu0 %v236_v7 }
  0x41   :  { %217 = vmatprep.subr.bf16.mxu0 %v314_v0 }
  0x44   :  { %218 = vmatpush3.bf16.msra.mxu0 %v237_v8 }
  0x47   :  { %220 = vmatmul.mubr.bf16.vlgmr.msra.gmra.mrb[0].mxu0 %v48_v9 }
 0x11a   :  { %v147_v11 = vpop.f32.mrb[0].mxu0 }
 0x11b   :  { %v166_v12 = vadd.f32 %v193_v10, %v147_v11  ;;  %v221_v13 = vpop.f32.mrb[1].mxu0 }
 0x11c   :  { %v150_v14 = vpop.f32.mrb[2].mxu0 }
 0x11d   :  { %v167_v15 = vmax.f32 %v166_v12, 0.0  ;;  %v222_v16 = vpop.f32.mrb[3].mxu0 }
 0x11f   :  { %168 = vst [vmem:[#allocation8] sm:$0xff] %v167_v15 }
 0x120   :  { %293 = shalt.err (!%p290_p6)
}
 0x121   :  { %s294_s2 = scalar_lea.hbm %s386_s3, 128 }
 0x122   :  { %p295_p7 = scmp.ne.s32.totalorder %s386_s3, %s294_s2  ;;  %p298_p8 = scmp.lt.u32.totalorder %s294_s2, %s386_s3 }
 0x124   :  { %p300_p9 = pnand %p298_p8, %p295_p7 }
 0x126   :  { %303 = shalt.err (!%p300_p9)
}
 0x127   :  { %178 = dma.vmem_to_hbm [thread:$0]  %s176_s12, 128, %s386_s3, [#allocation5]  }
 0x128   :  { %308 = dma.done.wait [#allocation5], 128  }
 0x129   :  { %309 = vsyncadd [#allocation5], 4294967168 }
 0x12a   :  { %182 = vsyncpa [#allocation4], 1 }
 0x12b   :  { %183 = vsyncpa [#allocation7], 1 }
 0x12c   :  { %184 = vsyncpa [#allocation5], 1 }

</bundles_post_ra>
